<compile_context>
chip_gen: v6e
topology: v6e:2x2x1
jax: 0.10.0
libtpu: 0.0.40
codegen_flags: <defaults>
</compile_context>

<pallas_src>
import functools

import jax
import jax.numpy as jnp
from jax.experimental import pallas as pl
from jax.experimental.pallas import tpu as pltpu


def _round_up(x, m):
    return -(-x // m) * m


def _default_num_partials():
    # 2 TensorCores per chip on v7x, 1 on v5e/v6e.
    try:
        kind = jax.devices()[0].device_kind.lower()
    except Exception:
        return 1
    return 2 if ("v7" in kind or "tpu7" in kind) else 1


def _custom_targets_ce_kernel(target_ref, x_ref, mt_ref, out_ref, acc_ref, *,
                              n_total, tn, inner_blocks, mask_tail):
    p = pl.program_id(0)   # partial index ("parallel" leading axis)
    i = pl.program_id(1)   # block index within this partial ("arbitrary" reduction)

    @pl.when(i == 0)
    def _():
        acc_ref[...] = jnp.zeros_like(acc_ref)

    x = x_ref[...].astype(jnp.float32)     # (C, TN) logits, classes on sublanes
    tgt = target_ref[...]                  # (1, TN) int32 targets, batch on lanes
    c = x.shape[0]

    # Numerically stable log-softmax over the class (sublane) axis: short reduces.
    mx = jnp.max(x, axis=0, keepdims=True)                 # (1, TN)
    se = jnp.sum(jnp.exp(x - mx), axis=0, keepdims=True)   # (1, TN)
    log_p = x - mx - jnp.log(se)                           # (C, TN)

    # y_true^T: column n is M[target[n], :].  Built with C VPU selects against the
    # columns of M^T (eta already folded in) -- no MXU, no gather.
    y_true = jnp.broadcast_to(mt_ref[:, 0:1], x.shape)     # class 0 default
    for t in range(1, c):
        y_true = jnp.where(tgt == t, mt_ref[:, t:t + 1], y_true)

    contrib = y_true * log_p                               # (C, TN)

    if mask_tail:
        # NaN-safe tail mask (jnp.where, not multiply-by-zero); compiled out entirely
        # when the padded batch equals the true batch.
        row0 = (p * inner_blocks + i) * tn
        lane = jax.lax.broadcasted_iota(jnp.int32, (1, tn), 1)
        contrib = jnp.where(row0 + lane < n_total, contrib, 0.0)

    # Vreg-dense accumulate; scalar collapse deferred to the finalize step.
    acc_ref[...] += contrib

    @pl.when(i == pl.num_programs(1) - 1)
    def _():
        col = jnp.sum(acc_ref[...], axis=1, keepdims=True)   # (C, 1)  lane reduce
        tot = jnp.sum(col, axis=0, keepdims=True)            # (1, 1)  sublane reduce
        out_ref[...] = (-tot).reshape(out_ref.shape)


def custom_targets_loss(input_logits, target, cls_probs, eta=1.0, *,
                        block_lanes=None, num_partials=None):
    """CustomTargetsLoss(base_loss=CrossEntropyLoss(), cls_probs, eta) forward."""
    n, c = input_logits.shape

    if num_partials is None:
        num_partials = _default_num_partials()

    # Fold eta into the soft-target matrix once; the kernel uses M^T so that column t
    # (a sublane vector) is the soft-label row for target class t.
    m = ((1.0 - float(eta)) * jnp.eye(c, dtype=jnp.float32)
         + float(eta) * cls_probs.astype(jnp.float32))
    mt = m.T                                                 # (C_class, C_target)

    # Lanes per block: ~512 KiB of dense logits per step, capped so the sublane-padded
    # target / accumulator buffers stay a few MiB total (fits every gen's scoped VMEM).
    tn = block_lanes if block_lanes is not None else (512 * 1024) // (4 * c)
    tn = _round_up(max(128, min(tn, 32768)), 128)
    tn = min(tn, _round_up(n, 128))

    inner_blocks = pl.cdiv(pl.cdiv(n, tn), num_partials)
    n_pad = num_partials * inner_blocks * tn

    # Lane-dense transposed layout: classes on sublanes, batch on lanes.  Single
    # transpose+pad materialisation (no dtype upcast copy; cast happens in-kernel).
    x_t = jnp.pad(jnp.transpose(input_logits), ((0, 0), (0, n_pad - n)))
    t2 = jnp.pad(target.reshape(1, n).astype(jnp.int32), ((0, 0), (0, n_pad - n)))

    kernel = functools.partial(
        _custom_targets_ce_kernel, n_total=n, tn=tn,
        inner_blocks=inner_blocks, mask_tail=(n_pad != n))

    partials = pl.pallas_call(
        kernel,
        out_shape=jax.ShapeDtypeStruct((num_partials, 1, 1), jnp.float32),
        grid_spec=pltpu.PrefetchScalarGridSpec(
            num_scalar_prefetch=0,
            grid=(num_partials, inner_blocks),
            in_specs=[
                pl.BlockSpec((1, tn), lambda p, i: (0, p * inner_blocks + i)),
                pl.BlockSpec((c, tn), lambda p, i: (0, p * inner_blocks + i)),
                pl.BlockSpec((c, c), lambda p, i: (0, 0)),   # tiny resident M^T
            ],
            out_specs=pl.BlockSpec((1, 1, 1), lambda p, i: (p, 0, 0)),
            scratch_shapes=[pltpu.VMEM((c, tn), jnp.float32)],
        ),
        compiler_params=pltpu.CompilerParams(
            dimension_semantics=("parallel", "arbitrary"),
            vmem_limit_bytes=32 * 1024 * 1024),
        cost_estimate=pl.CostEstimate(
            flops=10 * n_pad * c,
            transcendentals=n_pad * (c + 1),
            bytes_accessed=(n_pad * c + n_pad + c * c + num_partials) * 4,
        ),
    )(t2, x_t, mt)

    # Combine per-core partial sums; divide by the TRUE batch size.
    return jnp.sum(partials[:, 0, 0]) / jnp.float32(n)


def _reference_loss(input_logits, target, cls_probs, eta):
    """Pure-JAX reference mirroring the PyTorch module."""
    c = cls_probs.shape[0]
    y_prob = cls_probs[target]
    target_oh = jax.nn.one_hot(target, c, dtype=jnp.float32)
    y_true = (1.0 - eta) * target_oh + eta * y_prob
    log_p = jax.nn.log_softmax(input_logits.astype(jnp.float32), axis=-1)
    return jnp.mean(-jnp.sum(y_true * log_p, axis=-1))


if __name__ == "__main__":
    key = jax.random.PRNGKey(0)
    k1, k2, k3, k4 = jax.random.split(key, 4)

    # Case 1: small ordinal problem (single block, ragged tail, auto partials).
    N, C, ETA = 10, 4, 0.85
    idx = jnp.arange(C, dtype=jnp.float32)
    cls_probs = jnp.exp(-jnp.abs(idx[:, None] - idx[None, :]))
    cls_probs = cls_probs / jnp.sum(cls_probs, axis=-1, keepdims=True)
    x = jax.random.normal(k1, (N, C), dtype=jnp.float32)
    t = jax.random.randint(k2, (N,), 0, C, dtype=jnp.int32)

    loss = jax.block_until_ready(custom_targets_loss(x, t, cls_probs, eta=ETA))
    ref = _reference_loss(x, t, cls_probs, ETA)
    assert jnp.allclose(loss, ref, atol=1e-5, rtol=1e-5), (loss, ref)

    # Case 2: multi-block grid with ragged tail and a forced 2-partial split
    # (exercises the serial reduction, init/finalize, and masking paths).
    N2, C2, ETA2 = 300, 5, 0.3
    idx2 = jnp.arange(C2, dtype=jnp.float32)
    cp2 = jnp.exp(-0.5 * jnp.abs(idx2[:, None] - idx2[None, :]))
    cp2 = cp2 / jnp.sum(cp2, axis=-1, keepdims=True)
    x2 = jax.random.normal(k3, (N2, C2), dtype=jnp.float32)
    t2 = jax.random.randint(k4, (N2,), 0, C2, dtype=jnp.int32)

    loss2 = jax.block_until_ready(
        custom_targets_loss(x2, t2, cp2, eta=ETA2, block_lanes=128, num_partials=2))
    ref2 = _reference_loss(x2, t2, cp2, ETA2)
    assert jnp.allclose(loss2, ref2, atol=1e-5, rtol=1e-5), (loss2, ref2)

    print("KERNEL_OK")
</pallas_src>

<mosaic_0001>
module attributes {stable_mosaic.version = 11 : i64} {
  func.func @_custom_targets_ce_kernel(%arg0: i32, %arg1: i32, %arg2: memref<1x128xi32, #tpu.memory_space<vmem>>, %arg3: memref<4x128xf32, #tpu.memory_space<vmem>>, %arg4: memref<4x4xf32, #tpu.memory_space<vmem>>, %arg5: memref<1x1x1xf32, #tpu.memory_space<vmem>>, %arg6: memref<4x128xf32, #tpu.memory_space<vmem>>) attributes {dimension_semantics = [#tpu.dimension_semantics<parallel>, #tpu.dimension_semantics<arbitrary>], iteration_bounds = array<i64: 1, 1>, scalar_prefetch = 0 : i64, scratch_operands = 1 : i64, tpu.core_type = #tpu.core_type<tc>, window_params = [{transform_indices = @transform_0, window_bounds = array<i64: 1, 128>}, {transform_indices = @transform_1, window_bounds = array<i64: 4, 128>}, {pipeline_mode = #tpu.pipeline_mode<synchronous>, transform_indices = @transform_2, window_bounds = array<i64: 4, 4>}, {transform_indices = @transform_3, window_bounds = array<i64: 1, 1, 1>}]} {
    %c0_i32 = arith.constant 0 : i32
    %0 = arith.cmpi eq, %arg1, %c0_i32 : i32
    %1 = arith.extui %0 : i1 to i32
    %c0_i32_0 = arith.constant 0 : i32
    %2 = arith.cmpi ne, %1, %c0_i32_0 : i32
    scf.if %2 {
      %cst_18 = arith.constant 0.000000e+00 : f32
      %63 = vector.broadcast %cst_18 : f32 to vector<4x128xf32>
      %c0_19 = arith.constant 0 : index
      %c0_20 = arith.constant 0 : index
      %64 = vector.load %arg6[%c0_19, %c0_20] : memref<4x128xf32, #tpu.memory_space<vmem>>, vector<4x128xf32>
      tpu.vector_store %arg6[%c0_19, %c0_20], %63 {strides = array<i32>} : memref<4x128xf32, #tpu.memory_space<vmem>>, vector<4x128xf32>,
    } else {
    }
    %c0 = arith.constant 0 : index
    %c0_1 = arith.constant 0 : index
    %3 = vector.load %arg3[%c0, %c0_1] : memref<4x128xf32, #tpu.memory_space<vmem>>, vector<4x128xf32>
    %c0_2 = arith.constant 0 : index
    %c0_3 = arith.constant 0 : index
    %4 = vector.load %arg2[%c0_2, %c0_3] : memref<1x128xi32, #tpu.memory_space<vmem>>, vector<1x128xi32>
    %cst = arith.constant dense<0xFF800000> : vector<128xf32>
    %5 = vector.multi_reduction <maximumf>, %3, %cst [0] : vector<4x128xf32> to vector<128xf32>
    %6 = vector.shape_cast %5 : vector<128xf32> to vector<1x128xf32>
    %7 = vector.broadcast %6 : vector<1x128xf32> to vector<4x128xf32>
    %8 = arith.subf %3, %7 : vector<4x128xf32>
    %9 = math.exp %8 : vector<4x128xf32>
    %cst_4 = arith.constant dense<0.000000e+00> : vector<128xf32>
    %10 = vector.multi_reduction <add>, %9, %cst_4 [0] : vector<4x128xf32> to vector<128xf32>
    %11 = vector.shape_cast %10 : vector<128xf32> to vector<1x128xf32>
    %12 = vector.broadcast %6 : vector<1x128xf32> to vector<4x128xf32>
    %13 = arith.subf %3, %12 : vector<4x128xf32>
    %14 = math.log %11 : vector<1x128xf32>
    %15 = vector.broadcast %14 : vector<1x128xf32> to vector<4x128xf32>
    %16 = arith.subf %13, %15 : vector<4x128xf32>
    %c0_5 = arith.constant 0 : index
    %c0_6 = arith.constant 0 : index
    %17 = vector.load %arg4[%c0_5, %c0_6] : memref<4x4xf32, #tpu.memory_space<vmem>>, vector<4x1xf32>
    %18 = vector.shape_cast %17 : vector<4x1xf32> to vector<4x1xf32>
    %19 = vector.broadcast %18 : vector<4x1xf32> to vector<4x128xf32>
    %c1_i32 = arith.constant 1 : i32
    %20 = vector.broadcast %c1_i32 : i32 to vector<1x128xi32>
    %21 = arith.cmpi eq, %4, %20 : vector<1x128xi32>
    %c0_7 = arith.constant 0 : index
    %c1 = arith.constant 1 : index
    %22 = vector.load %arg4[%c0_7, %c1] : memref<4x4xf32, #tpu.memory_space<vmem>>, vector<4x1xf32>
    %23 = vector.shape_cast %21 : vector<1x128xi1> to vector<1x128xi1>
    %24 = vector.broadcast %23 : vector<1x128xi1> to vector<4x128xi1>
    %25 = vector.shape_cast %22 : vector<4x1xf32> to vector<4x1xf32>
    %26 = vector.broadcast %25 : vector<4x1xf32> to vector<4x128xf32>
    %27 = arith.select %24, %26, %19 : vector<4x128xi1>, vector<4x128xf32>
    %c2_i32 = arith.constant 2 : i32
    %28 = vector.broadcast %c2_i32 : i32 to vector<1x128xi32>
    %29 = arith.cmpi eq, %4, %28 : vector<1x128xi32>
    %c0_8 = arith.constant 0 : index
    %c2 = arith.constant 2 : index
    %30 = vector.load %arg4[%c0_8, %c2] : memref<4x4xf32, #tpu.memory_space<vmem>>, vector<4x1xf32>
    %31 = vector.shape_cast %29 : vector<1x128xi1> to vector<1x128xi1>
    %32 = vector.broadcast %31 : vector<1x128xi1> to vector<4x128xi1>
    %33 = vector.shape_cast %30 : vector<4x1xf32> to vector<4x1xf32>
    %34 = vector.broadcast %33 : vector<4x1xf32> to vector<4x128xf32>
    %35 = arith.select %32, %34, %27 : vector<4x128xi1>, vector<4x128xf32>
    %c3_i32 = arith.constant 3 : i32
    %36 = vector.broadcast %c3_i32 : i32 to vector<1x128xi32>
    %37 = arith.cmpi eq, %4, %36 : vector<1x128xi32>
    %c0_9 = arith.constant 0 : index
    %c3 = arith.constant 3 : index
    %38 = vector.load %arg4[%c0_9, %c3] : memref<4x4xf32, #tpu.memory_space<vmem>>, vector<4x1xf32>
    %39 = vector.shape_cast %37 : vector<1x128xi1> to vector<1x128xi1>
    %40 = vector.broadcast %39 : vector<1x128xi1> to vector<4x128xi1>
    %41 = vector.shape_cast %38 : vector<4x1xf32> to vector<4x1xf32>
    %42 = vector.broadcast %41 : vector<4x1xf32> to vector<4x128xf32>
    %43 = arith.select %40, %42, %35 : vector<4x128xi1>, vector<4x128xf32>
    %44 = arith.mulf %43, %16 : vector<4x128xf32>
    %c1_i32_10 = arith.constant 1 : i32
    %45 = arith.muli %arg0, %c1_i32_10 : i32
    %46 = arith.addi %45, %arg1 : i32
    %c128_i32 = arith.constant 128 : i32
    %47 = arith.muli %46, %c128_i32 : i32
    %48 = tpu.iota {dimensions = array<i32: 1>} : vector<1x128xi32>
    %49 = vector.broadcast %47 : i32 to vector<1x128xi32>
    %50 = arith.addi %49, %48 : vector<1x128xi32>
    %c10_i32 = arith.constant 10 : i32
    %51 = vector.broadcast %c10_i32 : i32 to vector<1x128xi32>
    %52 = arith.cmpi slt, %50, %51 : vector<1x128xi32>
    %cst_11 = arith.constant 0.000000e+00 : f32
    %53 = vector.shape_cast %52 : vector<1x128xi1> to vector<1x128xi1>
    %54 = vector.broadcast %53 : vector<1x128xi1> to vector<4x128xi1>
    %55 = vector.broadcast %cst_11 : f32 to vector<4x128xf32>
    %56 = arith.select %54, %44, %55 : vector<4x128xi1>, vector<4x128xf32>
    %c0_12 = arith.constant 0 : index
    %c0_13 = arith.constant 0 : index
    %57 = vector.load %arg6[%c0_12, %c0_13] : memref<4x128xf32, #tpu.memory_space<vmem>>, vector<4x128xf32>
    %58 = arith.addf %57, %56 : vector<4x128xf32>
    %c0_14 = arith.constant 0 : index
    %c0_15 = arith.constant 0 : index
    %59 = vector.load %arg6[%c0_14, %c0_15] : memref<4x128xf32, #tpu.memory_space<vmem>>, vector<4x128xf32>
    tpu.vector_store %arg6[%c0_14, %c0_15], %58 {strides = array<i32>} : memref<4x128xf32, #tpu.memory_space<vmem>>, vector<4x128xf32>,
    %c0_i32_16 = arith.constant 0 : i32
    %60 = arith.cmpi eq, %arg1, %c0_i32_16 : i32
    %61 = arith.extui %60 : i1 to i32
    %c0_i32_17 = arith.constant 0 : i32
    %62 = arith.cmpi ne, %61, %c0_i32_17 : i32
    scf.if %62 {
      %c0_18 = arith.constant 0 : index
      %c0_19 = arith.constant 0 : index
      %63 = vector.load %arg6[%c0_18, %c0_19] : memref<4x128xf32, #tpu.memory_space<vmem>>, vector<4x128xf32>
      %cst_20 = arith.constant dense<0.000000e+00> : vector<4xf32>
      %64 = vector.multi_reduction <add>, %63, %cst_20 [1] : vector<4x128xf32> to vector<4xf32>
      %65 = vector.shape_cast %64 : vector<4xf32> to vector<4x1xf32>
      %cst_21 = arith.constant dense<0.000000e+00> : vector<1xf32>
      %66 = vector.multi_reduction <add>, %65, %cst_21 [0] : vector<4x1xf32> to vector<1xf32>
      %67 = vector.shape_cast %66 : vector<1xf32> to vector<1x1xf32>
      %cst_22 = arith.constant 0.000000e+00 : f32
      %68 = vector.broadcast %cst_22 : f32 to vector<1x1xf32>
      %69 = arith.subf %68, %67 : vector<1x1xf32>
      %70 = vector.shape_cast %69 : vector<1x1xf32> to vector<1x1x1xf32>
      %c0_23 = arith.constant 0 : index
      %c0_24 = arith.constant 0 : index
      %c0_25 = arith.constant 0 : index
      %71 = vector.load %arg5[%c0_23, %c0_24, %c0_25] : memref<1x1x1xf32, #tpu.memory_space<vmem>>, vector<1x1x1xf32>
      tpu.vector_store %arg5[%c0_23, %c0_24, %c0_25], %70 {strides = array<i32>} : memref<1x1x1xf32, #tpu.memory_space<vmem>>, vector<1x1x1xf32>,
    } else {
    }
    return
  }
  func.func @transform_0(%arg0: i32, %arg1: i32) -> (i32, i32) {
    %c1_i32 = arith.constant 1 : i32
    %0 = arith.muli %arg0, %c1_i32 : i32
    %1 = arith.addi %0, %arg1 : i32
    %c0_i32 = arith.constant 0 : i32
    %c0_i32_0 = arith.constant 0 : i32
    return %c0_i32, %1 : i32, i32
  }
  func.func @transform_1(%arg0: i32, %arg1: i32) -> (i32, i32) {
    %c1_i32 = arith.constant 1 : i32
    %0 = arith.muli %arg0, %c1_i32 : i32
    %1 = arith.addi %0, %arg1 : i32
    %c0_i32 = arith.constant 0 : i32
    %c0_i32_0 = arith.constant 0 : i32
    return %c0_i32, %1 : i32, i32
  }
  func.func @transform_2(%arg0: i32, %arg1: i32) -> (i32, i32) {
    %c0_i32 = arith.constant 0 : i32
    %c0_i32_0 = arith.constant 0 : i32
    %c0_i32_1 = arith.constant 0 : i32
    return %c0_i32, %c0_i32_0 : i32, i32
  }
  func.func @transform_3(%arg0: i32, %arg1: i32) -> (i32, i32, i32) {
    %c0_i32 = arith.constant 0 : i32
    %c0_i32_0 = arith.constant 0 : i32
    %c0_i32_1 = arith.constant 0 : i32
    return %arg0, %c0_i32, %c0_i32_0 : i32, i32, i32
  }
}

</mosaic_0001>

<bundles_post_ra>
// kernel: tpu_custom_call.1
= control target key start
LH: loop header
LB: loop body
LE: loop exit
PB: predicated region body
PF: predicated region fallthrough
CT: control target
= control target key end

     0   :  { %8 = vsyncpa [#allocation4], 0  ;;  %s324_s0 = inlined_call_operand.hbm [shape: s32[1,128], index: 0, kind: input, shape index: {}]   ;;  %s325_s1 = inlined_call_operand.hbm [shape: f32[4,128], index: 1, kind: input, shape index: {}]   ;;  %s326_s2 = inlined_call_operand.hbm [shape: f32[4,4], index: 2, kind: input, shape index: {}]   ;;  %s327_s3 = inlined_call_operand.hbm [shape: f32[1,1,1], index: 3, kind: output, shape index: {}]  }
   0x1   :  { %9 = vsyncpa [#allocation7], 0 }
   0x2   :  { %10 = vsyncpa [#allocation5], 0  ;;  %s279_s12 = smov [#allocation6]   ;;  %s280_s14 = smov [#allocation3]  }
   0x3   :  { %s33_s13 = sshll.u32 %s279_s12, 4  ;;  %s20_s15 = sshll.u32 %s280_s14, 4  ;;  %s34_s13 = int_to_ptr.vmem [resolvable:$true] %s33_s13  ;;  %s21_s15 = int_to_ptr.vmem [resolvable:$true] %s20_s15 }
   0x4   :  { %s201_s16 = scalar_lea.vmem %s34_s13, 64  ;;  %p206_p1 = scmp.lt.s32.totalorder %s34_s13, %s34_s13 }
   0x5   :  { %p202_p0 = scmp.ne.s32.totalorder %s34_s13, %s201_s16  ;;  %p207_p2 = scmp.lt.s32.totalorder %s201_s16, %s201_s16 }
   0x7   :  { %p208_p3 = por %p207_p2, %p206_p1 }
   0x9   :  { %p209_p4 = pnand %p208_p3, %p202_p0 }
   0xb   :  { %212 = shalt.err (!%p209_p4)
}
   0xc   :  { %36 = dma.hbm_to_vmem [thread:$0]  %s325_s1, 64, %s34_s13, [#allocation7]  }
   0xd   :  { %s221_s19 = scalar_lea.vmem %s21_s15, 16  ;;  %s225_s20 = scalar_lea.vmem %s21_s15, 32 }
   0xe   :  { %p222_p5 = scmp.ne.s32.totalorder %s21_s15, %s221_s19  ;;  %p226_p6 = scmp.lt.s32.totalorder %s21_s15, %s21_s15 }
   0xf   :  { %p227_p7 = scmp.lt.s32.totalorder %s225_s20, %s221_s19 }
  0x11   :  { %p228_p8 = por %p227_p7, %p226_p6 }
  0x13   :  { %p229_p9 = pnand %p228_p8, %p222_p5 }
  0x15   :  { %232 = shalt.err (!%p229_p9)
}
  0x16   :  { %23 = dma.hbm_to_vmem [thread:$0]  %s324_s0, 16, %s21_s15, [#allocation4]  }
  0x17   :  { %s281_s23 = smov [#allocation8]  }
  0x18   :  { %s43_s24 = sshll.u32 %s281_s23, 4  ;;  %s44_s24 = int_to_ptr.vmem [resolvable:$true] %s43_s24 }
  0x19   :  { %s241_s25 = scalar_lea.vmem %s44_s24, 64  ;;  %p246_p11 = scmp.lt.s32.totalorder %s44_s24, %s44_s24 }
  0x1a   :  { %p242_p10 = scmp.ne.s32.totalorder %s44_s24, %s241_s25  ;;  %p247_p12 = scmp.lt.s32.totalorder %s241_s25, %s241_s25 }
  0x1c   :  { %p248_p13 = por %p247_p12, %p246_p11 }
  0x1e   :  { %p249_p0 = pnand %p248_p13, %p242_p10 }
  0x20   :  { %252 = shalt.err (!%p249_p0)
}
  0x21   :  { %46 = dma.hbm_to_vmem [thread:$0]  %s326_s2, 64, %s44_s24, [#allocation7]  }
  0x22   :  { %273 = dma.done.wait [#allocation4], 16  }
  0x23   :  { %274 = vsyncadd [#allocation4], 4294967280 }
  0x24   :  { %275 = dma.done.wait [#allocation7], 128  }
  0x25   :  { %276 = vsyncadd [#allocation7], 4294967168  ;;  %v282_v0 = vmov 0   ;;  %v283_v1 = vmov 2   ;;  %v86_v2 = vld [vmem:[#allocation8] sm:$0xf]  ;;  %v94_v24 = vlaneseq }
  0x26   :  { %184 = vset.pattern.permute.xlu0 %v282_v0  ;;  %186 = vset.pattern.permute.xlu1 %v283_v1  ;;  %v284_v3 = vmov 0.0   ;;  %v285_v4 = vmov 1   ;;  %v286_v5 = vmov 3   ;;  %vm65_vm0 = vcmask 1043456   ;;  %v63_v6 = vld [vmem:[#allocation6] sm:$0xf] }
  0x27   :  { %62 = vst [vmem:[#allocation2] sm:$0xf] %v284_v3  ;;  %89 = vperm.xlu0 %184, %v86_v2   ;;  %112 = vperm.xlu1 %186, %v86_v2   ;;  %v66_v7 = vsel %vm65_vm0, %v63_v6, -inf  ;;  %v64_v25 = vld [vmem:[#allocation3] sm:$0x1]  ;;  %v95_v26 = vshrl.u32 %v94_v24, 7 }
  0x28   :  { %v67_v8 = vrot.slane %v66_v7, 4  ;;  %vm92_vm1 = vcmp.eq.s32.totalorder %v64_v25, 1  ;;  %vm104_vm2 = vcmp.eq.s32.totalorder %v64_v25, 2  ;;  %vm116_vm3 = vcmp.eq.s32.totalorder %v64_v25, 3  ;;  %s287_s0 = smov [#allocation9]  }
  0x29   :  { %v96_v27 = vsub.s32 0, %v95_v26  ;;  %v93_v28 = vsel %vm92_vm1, 1, %v282_v0  ;;  %v105_v29 = vsel %vm104_vm2, 1, %v282_v0  ;;  %v117_v31 = vsel %vm116_vm3, 1, %v282_v0  ;;  %s165_s2 = sshll.u32 %s287_s0, 4  ;;  %s166_s2 = int_to_ptr.vmem [resolvable:$true] %s165_s2 }
  0x2a   :  { %v68_v9 = vmax.f32 %v66_v7, %v67_v8  ;;  %v132_v38 = vand.u32 127, %v94_v24  ;;  %vm157_vm8 = vcmask 0   ;;  %s253_s27 = scalar_lea.vmem %s166_s2, 16  ;;  %s257_s28 = scalar_lea.vmem %s166_s2, 32 }
  0x2b   :  { %185 = vset.pattern.permute.xlu0 %v285_v4  ;;  %187 = vset.pattern.permute.xlu1 %v286_v5  ;;  %v97_v32 = vrot.slane %v93_v28, %v96_v27  ;;  %v109_v35 = vrot.slane %v105_v29, %v96_v27  ;;  %v121_v37 = vrot.slane %v117_v31, %v96_v27  ;;  %p254_p1 = scmp.ne.s32.totalorder %s166_s2, %s253_s27  ;;  %p258_p2 = scmp.lt.s32.totalorder %s166_s2, %s166_s2 }
  0x2c   :  { %100 = vperm.xlu0 %185, %v86_v2   ;;  %124 = vperm.xlu1 %187, %v86_v2   ;;  %v69_v10 = vrot.slane %v68_v9, 2  ;;  %vm135_vm7 = vcmp.lt.s32.totalorder %v132_v38, 10  ;;  %p259_p3 = scmp.lt.s32.totalorder %s257_s28, %s253_s27 }
  0x2d   :  { %vm98_vm4 = vcmp.eq.s32.totalorder %v97_v32, 1  ;;  %vm110_vm5 = vcmp.eq.s32.totalorder %v109_v35, 1  ;;  %vm122_vm6 = vcmp.eq.s32.totalorder %v121_v37, 1 }
  0x2e   :  { %v70_v11 = vmax.f32 %v68_v9, %v69_v10  ;;  %v139_v46 = vld [vmem:[#allocation2] sm:$0xf]  ;;  %p260_p4 = por %p259_p3, %p258_p2 }
  0x30   :  { %188 = vset.pattern.permute.xlu0 %v286_v5  ;;  %v71_v12 = vrot.slane %v70_v11, 1  ;;  %p261_p5 = pnand %p260_p4, %p254_p1 }
  0x32   :  { %v72_v13 = vmax.f32 %v70_v11, %v71_v12 }
  0x34   :  { %v73_v14 = vsub.f32 %v63_v6, %v72_v13 }
  0x36   :  { %v74_v15 = vmul.f32 1.442695, %v73_v14 }
  0x38   :  { %189 = vpow2.f32 %v74_v15 }
  0x45   :  { %v190_v16 = vpop.eup %189 }
  0x46   :  { %v76_v17 = vsel %vm65_vm0, %v190_v16, 0.0 }
  0x47   :  { %v77_v18 = vrot.slane %v76_v17, 4 }
  0x49   :  { %v78_v19 = vadd.f32 %v77_v18, %v76_v17 }
  0x4b   :  { %v79_v20 = vrot.slane %v78_v19, 2 }
  0x4d   :  { %v80_v21 = vadd.f32 %v79_v20, %v78_v19 }
  0x4f   :  { %v81_v22 = vrot.slane %v80_v21, 1 }
  0x51   :  { %v82_v23 = vadd.f32 %v81_v22, %v80_v21 }
  0x53   :  { %191 = vlog2.f32 %v82_v23 }
  0x60   :  { %v192_v30 = vpop.eup %191 }
  0x61   :  { %v84_v36 = vmul.f32 0.6931472, %v192_v30 }
  0x63   :  { %v85_v41 = vsub.f32 %v73_v14, %v84_v36 }
  0xa2   :  { %v90_v33 = vpop.permute.xlu0 %89  ;;  %v113_v34 = vpop.permute.xlu1 %112 }
  0xa7   :  { %v101_v39 = vpop.permute.xlu0 %100  ;;  %v125_v40 = vpop.permute.xlu1 %124 }
  0xa8   :  { %v103_v42 = vsel %vm98_vm4, %v101_v39, %v90_v33 }
  0xa9   :  { %v115_v43 = vsel %vm110_vm5, %v113_v34, %v103_v42 }
  0xaa   :  { %v127_v44 = vsel %vm122_vm6, %v125_v40, %v115_v43 }
  0xab   :  { %v128_v45 = vmul.f32 %v127_v44, %v85_v41 }
  0xad   :  { %v138_v47 = vsel %vm135_vm7, %v128_v45, 0.0 }
  0xae   :  { %v140_v48 = vadd.f32 %v139_v46, %v138_v47 }
  0xb0   :  { %141 = vst [vmem:[#allocation2] sm:$0xf] %v140_v48 }
  0xb7   :  { %v145_v49 = vld [vmem:[#allocation2] sm:$0xf] }
  0xb8   :  { %v146_v50 = vsel %vm65_vm0, %v145_v49, 0.0 }
  0xb9   :  { %147 = vadd.xlane.f32.xlu1 %v146_v50 }
 0x142   :  { %v148_v51 = vpop.xlane.xlu1 %147 }
 0x143   :  { %v149_v52 = vsel %vm65_vm0, %v148_v51, 0.0 }
 0x144   :  { %v150_v53 = vrot.slane %v149_v52, 4 }
 0x146   :  { %v151_v54 = vadd.f32 %v150_v53, %v149_v52 }
 0x148   :  { %v152_v55 = vrot.slane %v151_v54, 2 }
 0x14a   :  { %v153_v56 = vadd.f32 %v152_v55, %v151_v54 }
 0x14c   :  { %v154_v57 = vrot.slane %v153_v56, 1 }
 0x14e   :  { %v155_v58 = vadd.f32 %v154_v57, %v153_v56 }
 0x150   :  { %v156_v59 = vsub.f32 0.0, %v155_v58 }
 0x152   :  { %158 = vst.msk [vmem:[#allocation9] sm:$0x1] %vm157_vm8, %v156_v59 }
 0x153   :  { %264 = shalt.err (!%p261_p5)
}
 0x154   :  { %168 = dma.vmem_to_hbm [thread:$0]  %s166_s2, 16, %s327_s3, [#allocation5]  }
 0x155   :  { %277 = dma.done.wait [#allocation5], 16  }
 0x156   :  { %278 = vsyncadd [#allocation5], 4294967280 }
 0x157   :  { %172 = vsyncpa [#allocation4], 1 }
 0x158   :  { %173 = vsyncpa [#allocation7], 1 }
 0x159   :  { %174 = vsyncpa [#allocation5], 1 }

</bundles_post_ra>
